<compile_context>
chip_gen: v7x
topology: tpu7x:2x2x1
jax: 0.10.0
libtpu: 0.0.40
codegen_flags: <defaults>
</compile_context>

<pallas_src>
import jax
import jax.numpy as jnp
from jax.experimental import pallas as pl
from jax.experimental.pallas import tpu as pltpu

# ---------------- model hyper-parameters (small, consistent with module) ----
N_NODES = 16
NODE_DIM = 8
HIDDEN = 32
HEADS = 4
EDGE_DIM = 2
NUM_LAYERS = 3
OUT_DIM = 1
LEAKY_SLOPE = 0.2          # GATConv default negative_slope
BN_EPS = 1e-5
NEG_INF = -1e30            # additive adjacency mask (f32)
LANES = 128

_LAYER_HEADS = tuple(HEADS if i < NUM_LAYERS - 1 else 1 for i in range(NUM_LAYERS))
_VMEM = pl.BlockSpec(memory_space=pltpu.MemorySpace.VMEM)

# ---------------- packed weight-slab row map (wslab: [W_ROWS, 128] f32) -----
R_W0SKIP = 0                    # [NODE_DIM, 2*HIDDEN]  = [W0 | skip0_w]
R_VEC = 8                       # 8-row block of tiny [1,*] vectors (see below)
R_ASD = (16, 48, 80)            # per-layer [HIDDEN, 2*H*N] src/dst attn expanders
R_W = (None, 112, 144)          # layer-1/2 input projections [HIDDEN, HIDDEN]
R_PW1 = 176                     # folded predictor w1 [HIDDEN, HIDDEN]
R_PW2 = 208                     # predictor w2 [HIDDEN, OUT_DIM]
W_ROWS = 240
# rows inside the R_VEC block:
#   0: skip0 bias | 1/3/5: scale(layer) | 2/4/6: shift(layer)
#   7: pred_b1 (cols 0:HIDDEN) and pred_b2 (col HIDDEN)

A_ROWS = (1 + NUM_LAYERS) * N_NODES     # activation slab: x + one bias block per layer


# ---------------------------- in-kernel constant selectors -------------------
def _selectors(heads):
    """Constant selector matrices for the head-packed lane layout, built from
    2-D iota + compares only (no div/mod) so they lower cleanly."""
    f32 = jnp.float32
    n = N_NODES
    ii = lambda shape, d: jax.lax.broadcasted_iota(jnp.int32, shape, d)
    eye_n = (ii((n, n), 0) == ii((n, n), 1)).astype(f32)
    if heads == 1:
        return eye_n, None, None, None
    hn, ch = heads * n, HIDDEN // heads
    G = jnp.concatenate([eye_n] * heads, axis=1)                          # [n, hn]
    rk, hk = ii((hn, heads), 0), ii((hn, heads), 1)
    KT = ((rk >= hk * n) & (rk < hk * n + n)).astype(f32)                 # [hn, heads]
    rh, cm = ii((heads, HIDDEN), 0), ii((heads, HIDDEN), 1)
    Kc = ((cm >= rh * ch) & (cm < rh * ch + ch)).astype(f32)              # [heads, HIDDEN]
    bmask = jnp.dot(KT, Kc, preferred_element_type=f32)                   # [hn, HIDDEN]
    return G, KT, Kc, bmask


# ---------------------------- fused Pallas kernel ----------------------------
def _gat_core(h, res, asd, bias, scale, shift, heads, sel, ones_nn):
    """One GAT layer + folded (bias+BN) + ELU + residual, heads packed on lanes."""
    f32 = jnp.float32
    G, KT, Kc, bmask = sel
    hn = heads * N_NODES
    ad = jnp.dot(h, asd, preferred_element_type=f32)                 # [N, 2*hn]
    src_rep = ad[:, 0:hn]         # src_rep[j, h*N+k] = a_src[j, h]  (any k in block h)
    dst_big = ad[:, hn:2 * hn]    # dst_big[i, h*N+j] = a_dst[i, h]
    # transpose-free broadcast of per-source scores into the packed layout:
    #   (ones_NN @ (src_rep * G))[i, h*N+j] = a_src[j, h]
    src_full = jnp.dot(ones_nn, src_rep * G, preferred_element_type=f32)
    logits = dst_big + src_full + bias        # bias = edge-attn logits + {0,-1e30} adjacency mask
    logits = jnp.where(logits > 0, logits, LEAKY_SLOPE * logits)     # LeakyReLU
    # shared row max: exact per-block softmax (shift-invariant), masked -> exp==0
    m = jnp.max(logits, axis=-1, keepdims=True)
    p = jnp.exp(logits - m)
    if heads == 1:
        inv_e = pl.reciprocal(jnp.sum(p, axis=-1, keepdims=True), approx=True)  # [N,1]
        hbig = h
    else:
        denom = jnp.dot(p, KT, preferred_element_type=f32)           # [N, heads] per-head sums
        inv_e = jnp.dot(pl.reciprocal(denom, approx=True), Kc,
                        preferred_element_type=f32)                  # [N, HIDDEN]
        hbig = jnp.concatenate([h] * heads, axis=0) * bmask          # block-diag h [hn, HIDDEN]
    out = jnp.dot(p, hbig, preferred_element_type=f32) * inv_e       # heads already lane-concatenated
    out = out * scale + shift                                        # GAT bias + BatchNorm(eval) folded
    out = jnp.where(out > 0, out, jnp.exp(out) - 1.0)                # ELU (dropout = id, eval)
    return out + res


def _fused_forward_kernel(w_ref, a_ref, o_ref):
    f32 = jnp.float32
    ones_nn = jnp.ones((N_NODES, N_NODES), f32)
    sels = {HEADS: _selectors(HEADS), 1: _selectors(1)}
    vecs = w_ref[R_VEC:R_VEC + 8, :]                                 # all tiny vectors, one aligned load

    x = a_ref[0:N_NODES, 0:NODE_DIM]
    # layer 0: feature projection + skip Linear fused into one matmul
    big0 = jnp.dot(x, w_ref[R_W0SKIP:R_W0SKIP + NODE_DIM, 0:2 * HIDDEN],
                   preferred_element_type=f32)                       # [N, 2*HIDDEN]
    h = big0[:, 0:HIDDEN]
    res = big0[:, HIDDEN:2 * HIDDEN] + vecs[0:1, 0:HIDDEN]           # + skip bias

    cur = None
    for li in range(NUM_LAYERS):
        heads = _LAYER_HEADS[li]
        hn = heads * N_NODES
        if li > 0:
            rw = R_W[li]
            h = jnp.dot(cur, w_ref[rw:rw + HIDDEN, 0:HIDDEN], preferred_element_type=f32)
            res = cur                                                # Identity skip (in_ch == hidden)
        asd = w_ref[R_ASD[li]:R_ASD[li] + HIDDEN, 0:2 * hn]
        bias = a_ref[(li + 1) * N_NODES:(li + 2) * N_NODES, 0:hn]
        scale = vecs[2 * li + 1:2 * li + 2, 0:HIDDEN]
        shift = vecs[2 * li + 2:2 * li + 3, 0:HIDDEN]
        cur = _gat_core(h, res, asd, bias, scale, shift, heads, sels[heads], ones_nn)

    # batch=None path: graph_embedding = [mean, mean]; the two pred_w1 halves
    # and the 1/N are pre-folded, so the pooled head reduces to sum-over-nodes.
    s = jnp.dot(jnp.ones((1, N_NODES), f32), cur, preferred_element_type=f32)   # [1, HIDDEN]
    hm = jnp.dot(s, w_ref[R_PW1:R_PW1 + HIDDEN, 0:HIDDEN],
                 preferred_element_type=f32) + vecs[7:8, 0:HIDDEN]
    hm = jnp.maximum(hm, 0.0)                                        # ReLU (dropout = id)
    o_ref[...] = (jnp.dot(hm, w_ref[R_PW2:R_PW2 + HIDDEN, 0:OUT_DIM],
                          preferred_element_type=f32)
                  + vecs[7:8, HIDDEN:HIDDEN + OUT_DIM])


def pallas_gnn_forward(wslab, aslab):
    return pl.pallas_call(
        _fused_forward_kernel,
        out_shape=jax.ShapeDtypeStruct((1, OUT_DIM), jnp.float32),
        in_specs=[_VMEM, _VMEM],
        out_specs=_VMEM,
    )(wslab, aslab)


# --------------------- glue: per-call activation slab -------------------------
def _build_aslab(x, edge_index, edge_attr, wecs):
    """x + per-layer packed attention bias slabs, built with one-hot matmuls
    (no XLA scatters).  GATConv(add_self_loops=True, fill_value='mean'): the
    self-loop edge_attr is the mean of incoming-edge attrs (graph is assumed
    self-loop-free; duplicate (src,dst) edges would be summed - none here)."""
    f32 = jnp.float32
    n = N_NODES
    node_ids = jnp.arange(n, dtype=edge_index.dtype)
    S = (edge_index[0][:, None] == node_ids[None, :]).astype(f32)    # [E, n] src one-hot
    D = (edge_index[1][:, None] == node_ids[None, :]).astype(f32)    # [E, n] dst one-hot
    adj = jnp.dot(D.T, S)                                            # [n(dst), n(src)]
    deg = jnp.sum(adj, axis=1)
    loop_attr = jnp.dot(D.T, edge_attr) / jnp.maximum(deg, 1.0)[:, None]
    eye = jnp.eye(n, dtype=f32)
    de = [jnp.dot(D.T, edge_attr[:, c:c + 1] * S) + eye * loop_attr[:, c][:, None]
          for c in range(EDGE_DIM)]                                  # dense edge attrs [n,n] x EDGE_DIM
    mbias = jnp.where(adj + eye > 0, 0.0, NEG_INF).astype(f32)       # additive adjacency mask

    aslab = jnp.zeros((A_ROWS, LANES), f32)
    aslab = aslab.at[0:n, 0:NODE_DIM].set(x)
    for li, wec in enumerate(wecs):
        heads = _LAYER_HEADS[li]
        blocks = [wec[0, hh] * de[0] + wec[1, hh] * de[1] + mbias for hh in range(heads)]
        bias = jnp.concatenate(blocks, axis=1)                       # [n, heads*n]
        aslab = aslab.at[(li + 1) * n:(li + 2) * n, 0:heads * n].set(bias)
    return aslab


# ---------------------------- parameter init / fold --------------------------
def init_params(key):
    keys = list(jax.random.split(key, 64))
    it = iter(keys)

    def nrm(shape, scale=0.1):
        return scale * jax.random.normal(next(it), shape, jnp.float32)

    params = {"layers": []}
    in_ch = NODE_DIM
    for i in range(NUM_LAYERS):
        heads = _LAYER_HEADS[i]
        ch = HIDDEN // heads
        out_ch = heads * ch
        params["layers"].append(dict(
            heads=heads, ch=ch,
            w=nrm((in_ch, heads * ch)),
            att_src=nrm((heads, ch)),
            att_dst=nrm((heads, ch)),
            lin_edge_w=nrm((EDGE_DIM, heads * ch)),
            att_edge=nrm((heads, ch)),
            bias=nrm((1, out_ch)),
            gamma=jnp.ones((1, out_ch), jnp.float32),
            beta=jnp.zeros((1, out_ch), jnp.float32),
            rm=jnp.zeros((1, out_ch), jnp.float32),
            rv=jnp.ones((1, out_ch), jnp.float32),
        ))
        in_ch = out_ch
    params["skip0_w"] = nrm((NODE_DIM, HIDDEN))
    params["skip0_b"] = nrm((1, HIDDEN))
    params["pred_w1"] = nrm((2 * HIDDEN, HIDDEN))
    params["pred_b1"] = nrm((1, HIDDEN))
    params["pred_w2"] = nrm((HIDDEN, OUT_DIM))
    params["pred_b2"] = nrm((1, OUT_DIM))
    return params


def fold_params(params):
    """Pack everything the kernel needs into one [W_ROWS,128] slab: expanded
    src/dst attention matrices, folded bias+BN scale/shift, fused layer-0
    projection+skip weight, and the folded predictor weights."""
    f32 = jnp.float32
    w = jnp.zeros((W_ROWS, LANES), f32)
    w = w.at[R_W0SKIP:R_W0SKIP + NODE_DIM, 0:HIDDEN].set(params["layers"][0]["w"])
    w = w.at[R_W0SKIP:R_W0SKIP + NODE_DIM, HIDDEN:2 * HIDDEN].set(params["skip0_w"])
    w = w.at[R_VEC + 0, 0:HIDDEN].set(params["skip0_b"][0])

    wecs = []
    for li, lyr in enumerate(params["layers"]):
        heads, ch = lyr["heads"], lyr["ch"]
        hn = heads * N_NODES
        asrc_big = jnp.zeros((HIDDEN, hn), f32)
        adst_big = jnp.zeros((HIDDEN, hn), f32)
        for hh in range(heads):
            asrc_big = asrc_big.at[hh * ch:(hh + 1) * ch, hh * N_NODES:(hh + 1) * N_NODES].set(
                jnp.broadcast_to(lyr["att_src"][hh][:, None], (ch, N_NODES)))
            adst_big = adst_big.at[hh * ch:(hh + 1) * ch, hh * N_NODES:(hh + 1) * N_NODES].set(
                jnp.broadcast_to(lyr["att_dst"][hh][:, None], (ch, N_NODES)))
        w = w.at[R_ASD[li]:R_ASD[li] + HIDDEN, 0:hn].set(asrc_big)
        w = w.at[R_ASD[li]:R_ASD[li] + HIDDEN, hn:2 * hn].set(adst_big)
        if li > 0:
            w = w.at[R_W[li]:R_W[li] + HIDDEN, 0:HIDDEN].set(lyr["w"])
        scale = lyr["gamma"] * jax.lax.rsqrt(lyr["rv"] + BN_EPS)
        shift = lyr["beta"] + (lyr["bias"] - lyr["rm"]) * scale
        w = w.at[R_VEC + 2 * li + 1, 0:HIDDEN].set(scale[0])
        w = w.at[R_VEC + 2 * li + 2, 0:HIDDEN].set(shift[0])
        # wec[e, h] = sum_c lin_edge_w[e, h*ch+c] * att_edge[h, c]
        wecs.append(jnp.einsum("ehc,hc->eh",
                               lyr["lin_edge_w"].reshape(EDGE_DIM, heads, ch),
                               lyr["att_edge"]))

    pw1f = (params["pred_w1"][:HIDDEN] + params["pred_w1"][HIDDEN:]) / N_NODES
    w = w.at[R_PW1:R_PW1 + HIDDEN, 0:HIDDEN].set(pw1f)
    w = w.at[R_PW2:R_PW2 + HIDDEN, 0:OUT_DIM].set(params["pred_w2"])
    w = w.at[R_VEC + 7, 0:HIDDEN].set(params["pred_b1"][0])
    w = w.at[R_VEC + 7, HIDDEN:HIDDEN + OUT_DIM].set(params["pred_b2"][0])
    return {"wslab": w, "wecs": wecs}


# ---------------------------- forward -----------------------------------------
@jax.jit
def gnn_forward(prep, x, edge_index, edge_attr):
    aslab = _build_aslab(x, edge_index, edge_attr, prep["wecs"])
    return pallas_gnn_forward(prep["wslab"], aslab)


# ---------------------------- main --------------------------------------------
if __name__ == "__main__":
    key = jax.random.PRNGKey(0)
    k_param, k_x, k_e = jax.random.split(key, 3)

    params = init_params(k_param)
    prep = fold_params(params)

    x = jax.random.normal(k_x, (N_NODES, NODE_DIM), jnp.float32)

    # deterministic directed edges (unique, no self loops): offsets 1, 3, 5 on a ring
    srcs, dsts = [], []
    for off in (1, 3, 5):
        srcs.append(jnp.arange(N_NODES, dtype=jnp.int32))
        dsts.append((jnp.arange(N_NODES, dtype=jnp.int32) + off) % N_NODES)
    edge_index = jnp.stack([jnp.concatenate(srcs), jnp.concatenate(dsts)])  # [2, 48]
    edge_attr = jax.random.normal(k_e, (edge_index.shape[1], EDGE_DIM), jnp.float32)

    out = gnn_forward(prep, x, edge_index, edge_attr)
    out = jax.block_until_ready(out)
    assert out.shape == (1, OUT_DIM), out.shape
    assert bool(jnp.isfinite(out).all())
    print("KERNEL_OK")
</pallas_src>

<mosaic_0001>
module attributes {stable_mosaic.version = 11 : i64} {
  func.func @_fused_forward_kernel(%arg0: memref<240x128xf32, #tpu.memory_space<vmem>>, %arg1: memref<64x128xf32, #tpu.memory_space<vmem>>, %arg2: memref<1x1xf32, #tpu.memory_space<vmem>>) attributes {dimension_semantics = [], scalar_prefetch = 0 : i64, scratch_operands = 0 : i64, tpu.core_type = #tpu.core_type<tc>} {
    %cst = arith.constant 1.000000e+00 : f32
    %0 = vector.broadcast %cst : f32 to vector<16x16xf32>
    %1 = tpu.iota {dimensions = array<i32: 0>} : vector<16x16xi32>
    %2 = tpu.iota {dimensions = array<i32: 1>} : vector<16x16xi32>
    %3 = arith.cmpi eq, %1, %2 : vector<16x16xi32>
    %4 = arith.extui %3 : vector<16x16xi1> to vector<16x16xi32>
    %5 = arith.sitofp %4 : vector<16x16xi32> to vector<16x16xf32>
    %6 = tpu.concatenate %5, %5, %5, %5 in 1 : vector<16x16xf32>, vector<16x16xf32>, vector<16x16xf32>, vector<16x16xf32> -> vector<16x64xf32>
    %7 = tpu.iota {dimensions = array<i32: 0>} : vector<64x4xi32>
    %8 = tpu.iota {dimensions = array<i32: 1>} : vector<64x4xi32>
    %c16_i32 = arith.constant 16 : i32
    %9 = vector.broadcast %c16_i32 : i32 to vector<64x4xi32>
    %10 = arith.muli %8, %9 : vector<64x4xi32>
    %11 = arith.cmpi sge, %7, %10 : vector<64x4xi32>
    %c16_i32_0 = arith.constant 16 : i32
    %12 = vector.broadcast %c16_i32_0 : i32 to vector<64x4xi32>
    %13 = arith.muli %8, %12 : vector<64x4xi32>
    %c16_i32_1 = arith.constant 16 : i32
    %14 = vector.broadcast %c16_i32_1 : i32 to vector<64x4xi32>
    %15 = arith.addi %13, %14 : vector<64x4xi32>
    %16 = arith.cmpi slt, %7, %15 : vector<64x4xi32>
    %17 = arith.andi %11, %16 : vector<64x4xi1>
    %18 = arith.extui %17 : vector<64x4xi1> to vector<64x4xi32>
    %19 = arith.sitofp %18 : vector<64x4xi32> to vector<64x4xf32>
    %20 = tpu.iota {dimensions = array<i32: 0>} : vector<4x32xi32>
    %21 = tpu.iota {dimensions = array<i32: 1>} : vector<4x32xi32>
    %c8_i32 = arith.constant 8 : i32
    %22 = vector.broadcast %c8_i32 : i32 to vector<4x32xi32>
    %23 = arith.muli %20, %22 : vector<4x32xi32>
    %24 = arith.cmpi sge, %21, %23 : vector<4x32xi32>
    %c8_i32_2 = arith.constant 8 : i32
    %25 = vector.broadcast %c8_i32_2 : i32 to vector<4x32xi32>
    %26 = arith.muli %20, %25 : vector<4x32xi32>
    %c8_i32_3 = arith.constant 8 : i32
    %27 = vector.broadcast %c8_i32_3 : i32 to vector<4x32xi32>
    %28 = arith.addi %26, %27 : vector<4x32xi32>
    %29 = arith.cmpi slt, %21, %28 : vector<4x32xi32>
    %30 = arith.andi %24, %29 : vector<4x32xi1>
    %31 = arith.extui %30 : vector<4x32xi1> to vector<4x32xi32>
    %32 = arith.sitofp %31 : vector<4x32xi32> to vector<4x32xf32>
    %cst_4 = arith.constant dense<0.000000e+00> : vector<64x32xf32>
    %33 = tpu.matmul %19, %32, %cst_4 {dimension_numbers = #tpu.dot_dimension_numbers<[1], [0], [0], [1], [0, 0, 1, 1], [], []>} : vector<64x4xf32>, vector<4x32xf32>, vector<64x32xf32> -> vector<64x32xf32>
    %34 = tpu.iota {dimensions = array<i32: 0>} : vector<16x16xi32>
    %35 = tpu.iota {dimensions = array<i32: 1>} : vector<16x16xi32>
    %36 = arith.cmpi eq, %34, %35 : vector<16x16xi32>
    %37 = arith.extui %36 : vector<16x16xi1> to vector<16x16xi32>
    %38 = arith.sitofp %37 : vector<16x16xi32> to vector<16x16xf32>
    %c8 = arith.constant 8 : index
    %c0 = arith.constant 0 : index
    %39 = vector.load %arg0[%c8, %c0] : memref<240x128xf32, #tpu.memory_space<vmem>>, vector<8x128xf32>
    %c0_5 = arith.constant 0 : index
    %c0_6 = arith.constant 0 : index
    %40 = vector.load %arg1[%c0_5, %c0_6] : memref<64x128xf32, #tpu.memory_space<vmem>>, vector<16x8xf32>
    %c0_7 = arith.constant 0 : index
    %c0_8 = arith.constant 0 : index
    %41 = vector.load %arg0[%c0_7, %c0_8] : memref<240x128xf32, #tpu.memory_space<vmem>>, vector<8x64xf32>
    %cst_9 = arith.constant dense<0.000000e+00> : vector<16x64xf32>
    %42 = tpu.matmul %40, %41, %cst_9 {dimension_numbers = #tpu.dot_dimension_numbers<[1], [0], [0], [1], [0, 0, 1, 1], [], []>} : vector<16x8xf32>, vector<8x64xf32>, vector<16x64xf32> -> vector<16x64xf32>
    %43 = vector.extract_strided_slice %42 {offsets = [0, 0], sizes = [16, 32], strides = [1, 1]} : vector<16x64xf32> to vector<16x32xf32>
    %44 = vector.extract_strided_slice %42 {offsets = [0, 32], sizes = [16, 32], strides = [1, 1]} : vector<16x64xf32> to vector<16x32xf32>
    %45 = vector.extract_strided_slice %39 {offsets = [0, 0], sizes = [1, 32], strides = [1, 1]} : vector<8x128xf32> to vector<1x32xf32>
    %46 = vector.broadcast %45 : vector<1x32xf32> to vector<16x32xf32>
    %47 = arith.addf %44, %46 : vector<16x32xf32>
    %c16 = arith.constant 16 : index
    %c0_10 = arith.constant 0 : index
    %48 = vector.load %arg0[%c16, %c0_10] : memref<240x128xf32, #tpu.memory_space<vmem>>, vector<32x128xf32>
    %c16_11 = arith.constant 16 : index
    %c0_12 = arith.constant 0 : index
    %49 = vector.load %arg1[%c16_11, %c0_12] : memref<64x128xf32, #tpu.memory_space<vmem>>, vector<16x64xf32>
    %50 = vector.extract_strided_slice %39 {offsets = [1, 0], sizes = [1, 32], strides = [1, 1]} : vector<8x128xf32> to vector<1x32xf32>
    %51 = vector.extract_strided_slice %39 {offsets = [2, 0], sizes = [1, 32], strides = [1, 1]} : vector<8x128xf32> to vector<1x32xf32>
    %cst_13 = arith.constant dense<0.000000e+00> : vector<16x128xf32>
    %52 = tpu.matmul %43, %48, %cst_13 {dimension_numbers = #tpu.dot_dimension_numbers<[1], [0], [0], [1], [0, 0, 1, 1], [], []>} : vector<16x32xf32>, vector<32x128xf32>, vector<16x128xf32> -> vector<16x128xf32>
    %53 = vector.extract_strided_slice %52 {offsets = [0, 0], sizes = [16, 64], strides = [1, 1]} : vector<16x128xf32> to vector<16x64xf32>
    %54 = vector.extract_strided_slice %52 {offsets = [0, 64], sizes = [16, 64], strides = [1, 1]} : vector<16x128xf32> to vector<16x64xf32>
    %55 = arith.mulf %53, %6 : vector<16x64xf32>
    %cst_14 = arith.constant dense<0.000000e+00> : vector<16x64xf32>
    %56 = tpu.matmul %0, %55, %cst_14 {dimension_numbers = #tpu.dot_dimension_numbers<[1], [0], [0], [1], [0, 0, 1, 1], [], []>} : vector<16x16xf32>, vector<16x64xf32>, vector<16x64xf32> -> vector<16x64xf32>
    %57 = arith.addf %54, %56 : vector<16x64xf32>
    %58 = arith.addf %57, %49 : vector<16x64xf32>
    %cst_15 = arith.constant 0.000000e+00 : f32
    %59 = vector.broadcast %cst_15 : f32 to vector<16x64xf32>
    %60 = arith.cmpf ogt, %58, %59 : vector<16x64xf32>
    %cst_16 = arith.constant 2.000000e-01 : f32
    %61 = vector.broadcast %cst_16 : f32 to vector<16x64xf32>
    %62 = arith.mulf %61, %58 : vector<16x64xf32>
    %63 = arith.select %60, %58, %62 : vector<16x64xi1>, vector<16x64xf32>
    %cst_17 = arith.constant dense<0xFF800000> : vector<16xf32>
    %64 = vector.multi_reduction <maximumf>, %63, %cst_17 [1] : vector<16x64xf32> to vector<16xf32>
    %65 = vector.shape_cast %64 : vector<16xf32> to vector<16x1xf32>
    %66 = vector.broadcast %65 : vector<16x1xf32> to vector<16x64xf32>
    %67 = arith.subf %63, %66 : vector<16x64xf32>
    %68 = math.exp %67 : vector<16x64xf32>
    %cst_18 = arith.constant dense<0.000000e+00> : vector<16x4xf32>
    %69 = tpu.matmul %68, %19, %cst_18 {dimension_numbers = #tpu.dot_dimension_numbers<[1], [0], [0], [1], [0, 0, 1, 1], [], []>} : vector<16x64xf32>, vector<64x4xf32>, vector<16x4xf32> -> vector<16x4xf32>
    %70 = tpu.reciprocal %69 {approx = true} : vector<16x4xf32> -> vector<16x4xf32>
    %cst_19 = arith.constant dense<0.000000e+00> : vector<16x32xf32>
    %71 = tpu.matmul %70, %32, %cst_19 {dimension_numbers = #tpu.dot_dimension_numbers<[1], [0], [0], [1], [0, 0, 1, 1], [], []>} : vector<16x4xf32>, vector<4x32xf32>, vector<16x32xf32> -> vector<16x32xf32>
    %72 = tpu.concatenate %43, %43, %43, %43 in 0 : vector<16x32xf32>, vector<16x32xf32>, vector<16x32xf32>, vector<16x32xf32> -> vector<64x32xf32>
    %73 = arith.mulf %72, %33 : vector<64x32xf32>
    %cst_20 = arith.constant dense<0.000000e+00> : vector<16x32xf32>
    %74 = tpu.matmul %68, %73, %cst_20 {dimension_numbers = #tpu.dot_dimension_numbers<[1], [0], [0], [1], [0, 0, 1, 1], [], []>} : vector<16x64xf32>, vector<64x32xf32>, vector<16x32xf32> -> vector<16x32xf32>
    %75 = arith.mulf %74, %71 : vector<16x32xf32>
    %76 = vector.broadcast %50 : vector<1x32xf32> to vector<16x32xf32>
    %77 = arith.mulf %75, %76 : vector<16x32xf32>
    %78 = vector.broadcast %51 : vector<1x32xf32> to vector<16x32xf32>
    %79 = arith.addf %77, %78 : vector<16x32xf32>
    %cst_21 = arith.constant 0.000000e+00 : f32
    %80 = vector.broadcast %cst_21 : f32 to vector<16x32xf32>
    %81 = arith.cmpf ogt, %79, %80 : vector<16x32xf32>
    %82 = math.exp %79 : vector<16x32xf32>
    %cst_22 = arith.constant 1.000000e+00 : f32
    %83 = vector.broadcast %cst_22 : f32 to vector<16x32xf32>
    %84 = arith.subf %82, %83 : vector<16x32xf32>
    %85 = arith.select %81, %79, %84 : vector<16x32xi1>, vector<16x32xf32>
    %86 = arith.addf %85, %47 : vector<16x32xf32>
    %c112 = arith.constant 112 : index
    %c0_23 = arith.constant 0 : index
    %87 = vector.load %arg0[%c112, %c0_23] : memref<240x128xf32, #tpu.memory_space<vmem>>, vector<32x32xf32>
    %cst_24 = arith.constant dense<0.000000e+00> : vector<16x32xf32>
    %88 = tpu.matmul %86, %87, %cst_24 {dimension_numbers = #tpu.dot_dimension_numbers<[1], [0], [0], [1], [0, 0, 1, 1], [], []>} : vector<16x32xf32>, vector<32x32xf32>, vector<16x32xf32> -> vector<16x32xf32>
    %c48 = arith.constant 48 : index
    %c0_25 = arith.constant 0 : index
    %89 = vector.load %arg0[%c48, %c0_25] : memref<240x128xf32, #tpu.memory_space<vmem>>, vector<32x128xf32>
    %c32 = arith.constant 32 : index
    %c0_26 = arith.constant 0 : index
    %90 = vector.load %arg1[%c32, %c0_26] : memref<64x128xf32, #tpu.memory_space<vmem>>, vector<16x64xf32>
    %91 = vector.extract_strided_slice %39 {offsets = [3, 0], sizes = [1, 32], strides = [1, 1]} : vector<8x128xf32> to vector<1x32xf32>
    %92 = vector.extract_strided_slice %39 {offsets = [4, 0], sizes = [1, 32], strides = [1, 1]} : vector<8x128xf32> to vector<1x32xf32>
    %cst_27 = arith.constant dense<0.000000e+00> : vector<16x128xf32>
    %93 = tpu.matmul %88, %89, %cst_27 {dimension_numbers = #tpu.dot_dimension_numbers<[1], [0], [0], [1], [0, 0, 1, 1], [], []>} : vector<16x32xf32>, vector<32x128xf32>, vector<16x128xf32> -> vector<16x128xf32>
    %94 = vector.extract_strided_slice %93 {offsets = [0, 0], sizes = [16, 64], strides = [1, 1]} : vector<16x128xf32> to vector<16x64xf32>
    %95 = vector.extract_strided_slice %93 {offsets = [0, 64], sizes = [16, 64], strides = [1, 1]} : vector<16x128xf32> to vector<16x64xf32>
    %96 = arith.mulf %94, %6 : vector<16x64xf32>
    %cst_28 = arith.constant dense<0.000000e+00> : vector<16x64xf32>
    %97 = tpu.matmul %0, %96, %cst_28 {dimension_numbers = #tpu.dot_dimension_numbers<[1], [0], [0], [1], [0, 0, 1, 1], [], []>} : vector<16x16xf32>, vector<16x64xf32>, vector<16x64xf32> -> vector<16x64xf32>
    %98 = arith.addf %95, %97 : vector<16x64xf32>
    %99 = arith.addf %98, %90 : vector<16x64xf32>
    %cst_29 = arith.constant 0.000000e+00 : f32
    %100 = vector.broadcast %cst_29 : f32 to vector<16x64xf32>
    %101 = arith.cmpf ogt, %99, %100 : vector<16x64xf32>
    %cst_30 = arith.constant 2.000000e-01 : f32
    %102 = vector.broadcast %cst_30 : f32 to vector<16x64xf32>
    %103 = arith.mulf %102, %99 : vector<16x64xf32>
    %104 = arith.select %101, %99, %103 : vector<16x64xi1>, vector<16x64xf32>
    %cst_31 = arith.constant dense<0xFF800000> : vector<16xf32>
    %105 = vector.multi_reduction <maximumf>, %104, %cst_31 [1] : vector<16x64xf32> to vector<16xf32>
    %106 = vector.shape_cast %105 : vector<16xf32> to vector<16x1xf32>
    %107 = vector.broadcast %106 : vector<16x1xf32> to vector<16x64xf32>
    %108 = arith.subf %104, %107 : vector<16x64xf32>
    %109 = math.exp %108 : vector<16x64xf32>
    %cst_32 = arith.constant dense<0.000000e+00> : vector<16x4xf32>
    %110 = tpu.matmul %109, %19, %cst_32 {dimension_numbers = #tpu.dot_dimension_numbers<[1], [0], [0], [1], [0, 0, 1, 1], [], []>} : vector<16x64xf32>, vector<64x4xf32>, vector<16x4xf32> -> vector<16x4xf32>
    %111 = tpu.reciprocal %110 {approx = true} : vector<16x4xf32> -> vector<16x4xf32>
    %cst_33 = arith.constant dense<0.000000e+00> : vector<16x32xf32>
    %112 = tpu.matmul %111, %32, %cst_33 {dimension_numbers = #tpu.dot_dimension_numbers<[1], [0], [0], [1], [0, 0, 1, 1], [], []>} : vector<16x4xf32>, vector<4x32xf32>, vector<16x32xf32> -> vector<16x32xf32>
    %113 = tpu.concatenate %88, %88, %88, %88 in 0 : vector<16x32xf32>, vector<16x32xf32>, vector<16x32xf32>, vector<16x32xf32> -> vector<64x32xf32>
    %114 = arith.mulf %113, %33 : vector<64x32xf32>
    %cst_34 = arith.constant dense<0.000000e+00> : vector<16x32xf32>
    %115 = tpu.matmul %109, %114, %cst_34 {dimension_numbers = #tpu.dot_dimension_numbers<[1], [0], [0], [1], [0, 0, 1, 1], [], []>} : vector<16x64xf32>, vector<64x32xf32>, vector<16x32xf32> -> vector<16x32xf32>
    %116 = arith.mulf %115, %112 : vector<16x32xf32>
    %117 = vector.broadcast %91 : vector<1x32xf32> to vector<16x32xf32>
    %118 = arith.mulf %116, %117 : vector<16x32xf32>
    %119 = vector.broadcast %92 : vector<1x32xf32> to vector<16x32xf32>
    %120 = arith.addf %118, %119 : vector<16x32xf32>
    %cst_35 = arith.constant 0.000000e+00 : f32
    %121 = vector.broadcast %cst_35 : f32 to vector<16x32xf32>
    %122 = arith.cmpf ogt, %120, %121 : vector<16x32xf32>
    %123 = math.exp %120 : vector<16x32xf32>
    %cst_36 = arith.constant 1.000000e+00 : f32
    %124 = vector.broadcast %cst_36 : f32 to vector<16x32xf32>
    %125 = arith.subf %123, %124 : vector<16x32xf32>
    %126 = arith.select %122, %120, %125 : vector<16x32xi1>, vector<16x32xf32>
    %127 = arith.addf %126, %86 : vector<16x32xf32>
    %c144 = arith.constant 144 : index
    %c0_37 = arith.constant 0 : index
    %128 = vector.load %arg0[%c144, %c0_37] : memref<240x128xf32, #tpu.memory_space<vmem>>, vector<32x32xf32>
    %cst_38 = arith.constant dense<0.000000e+00> : vector<16x32xf32>
    %129 = tpu.matmul %127, %128, %cst_38 {dimension_numbers = #tpu.dot_dimension_numbers<[1], [0], [0], [1], [0, 0, 1, 1], [], []>} : vector<16x32xf32>, vector<32x32xf32>, vector<16x32xf32> -> vector<16x32xf32>
    %c80 = arith.constant 80 : index
    %c0_39 = arith.constant 0 : index
    %130 = vector.load %arg0[%c80, %c0_39] : memref<240x128xf32, #tpu.memory_space<vmem>>, vector<32x32xf32>
    %c48_40 = arith.constant 48 : index
    %c0_41 = arith.constant 0 : index
    %131 = vector.load %arg1[%c48_40, %c0_41] : memref<64x128xf32, #tpu.memory_space<vmem>>, vector<16x16xf32>
    %132 = vector.extract_strided_slice %39 {offsets = [5, 0], sizes = [1, 32], strides = [1, 1]} : vector<8x128xf32> to vector<1x32xf32>
    %133 = vector.extract_strided_slice %39 {offsets = [6, 0], sizes = [1, 32], strides = [1, 1]} : vector<8x128xf32> to vector<1x32xf32>
    %cst_42 = arith.constant dense<0.000000e+00> : vector<16x32xf32>
    %134 = tpu.matmul %129, %130, %cst_42 {dimension_numbers = #tpu.dot_dimension_numbers<[1], [0], [0], [1], [0, 0, 1, 1], [], []>} : vector<16x32xf32>, vector<32x32xf32>, vector<16x32xf32> -> vector<16x32xf32>
    %135 = vector.extract_strided_slice %134 {offsets = [0, 0], sizes = [16, 16], strides = [1, 1]} : vector<16x32xf32> to vector<16x16xf32>
    %136 = vector.extract_strided_slice %134 {offsets = [0, 16], sizes = [16, 16], strides = [1, 1]} : vector<16x32xf32> to vector<16x16xf32>
    %137 = arith.mulf %135, %38 : vector<16x16xf32>
    %cst_43 = arith.constant dense<0.000000e+00> : vector<16x16xf32>
    %138 = tpu.matmul %0, %137, %cst_43 {dimension_numbers = #tpu.dot_dimension_numbers<[1], [0], [0], [1], [0, 0, 1, 1], [], []>} : vector<16x16xf32>, vector<16x16xf32>, vector<16x16xf32> -> vector<16x16xf32>
    %139 = arith.addf %136, %138 : vector<16x16xf32>
    %140 = arith.addf %139, %131 : vector<16x16xf32>
    %cst_44 = arith.constant 0.000000e+00 : f32
    %141 = vector.broadcast %cst_44 : f32 to vector<16x16xf32>
    %142 = arith.cmpf ogt, %140, %141 : vector<16x16xf32>
    %cst_45 = arith.constant 2.000000e-01 : f32
    %143 = vector.broadcast %cst_45 : f32 to vector<16x16xf32>
    %144 = arith.mulf %143, %140 : vector<16x16xf32>
    %145 = arith.select %142, %140, %144 : vector<16x16xi1>, vector<16x16xf32>
    %cst_46 = arith.constant dense<0xFF800000> : vector<16xf32>
    %146 = vector.multi_reduction <maximumf>, %145, %cst_46 [1] : vector<16x16xf32> to vector<16xf32>
    %147 = vector.shape_cast %146 : vector<16xf32> to vector<16x1xf32>
    %148 = vector.broadcast %147 : vector<16x1xf32> to vector<16x16xf32>
    %149 = arith.subf %145, %148 : vector<16x16xf32>
    %150 = math.exp %149 : vector<16x16xf32>
    %cst_47 = arith.constant dense<0.000000e+00> : vector<16xf32>
    %151 = vector.multi_reduction <add>, %150, %cst_47 [1] : vector<16x16xf32> to vector<16xf32>
    %152 = vector.shape_cast %151 : vector<16xf32> to vector<16x1xf32>
    %153 = tpu.reciprocal %152 {approx = true} : vector<16x1xf32> -> vector<16x1xf32>
    %cst_48 = arith.constant dense<0.000000e+00> : vector<16x32xf32>
    %154 = tpu.matmul %150, %129, %cst_48 {dimension_numbers = #tpu.dot_dimension_numbers<[1], [0], [0], [1], [0, 0, 1, 1], [], []>} : vector<16x16xf32>, vector<16x32xf32>, vector<16x32xf32> -> vector<16x32xf32>
    %155 = vector.broadcast %153 : vector<16x1xf32> to vector<16x32xf32>
    %156 = arith.mulf %154, %155 : vector<16x32xf32>
    %157 = vector.broadcast %132 : vector<1x32xf32> to vector<16x32xf32>
    %158 = arith.mulf %156, %157 : vector<16x32xf32>
    %159 = vector.broadcast %133 : vector<1x32xf32> to vector<16x32xf32>
    %160 = arith.addf %158, %159 : vector<16x32xf32>
    %cst_49 = arith.constant 0.000000e+00 : f32
    %161 = vector.broadcast %cst_49 : f32 to vector<16x32xf32>
    %162 = arith.cmpf ogt, %160, %161 : vector<16x32xf32>
    %163 = math.exp %160 : vector<16x32xf32>
    %cst_50 = arith.constant 1.000000e+00 : f32
    %164 = vector.broadcast %cst_50 : f32 to vector<16x32xf32>
    %165 = arith.subf %163, %164 : vector<16x32xf32>
    %166 = arith.select %162, %160, %165 : vector<16x32xi1>, vector<16x32xf32>
    %167 = arith.addf %166, %127 : vector<16x32xf32>
    %cst_51 = arith.constant 1.000000e+00 : f32
    %168 = vector.broadcast %cst_51 : f32 to vector<1x16xf32>
    %cst_52 = arith.constant dense<0.000000e+00> : vector<1x32xf32>
    %169 = tpu.matmul %168, %167, %cst_52 {dimension_numbers = #tpu.dot_dimension_numbers<[1], [0], [0], [1], [0, 0, 1, 1], [], []>} : vector<1x16xf32>, vector<16x32xf32>, vector<1x32xf32> -> vector<1x32xf32>
    %c176 = arith.constant 176 : index
    %c0_53 = arith.constant 0 : index
    %170 = vector.load %arg0[%c176, %c0_53] : memref<240x128xf32, #tpu.memory_space<vmem>>, vector<32x32xf32>
    %cst_54 = arith.constant dense<0.000000e+00> : vector<1x32xf32>
    %171 = tpu.matmul %169, %170, %cst_54 {dimension_numbers = #tpu.dot_dimension_numbers<[1], [0], [0], [1], [0, 0, 1, 1], [], []>} : vector<1x32xf32>, vector<32x32xf32>, vector<1x32xf32> -> vector<1x32xf32>
    %172 = vector.extract_strided_slice %39 {offsets = [7, 0], sizes = [1, 32], strides = [1, 1]} : vector<8x128xf32> to vector<1x32xf32>
    %173 = arith.addf %171, %172 : vector<1x32xf32>
    %cst_55 = arith.constant 0.000000e+00 : f32
    %174 = vector.broadcast %cst_55 : f32 to vector<1x32xf32>
    %175 = arith.maximumf %173, %174 : vector<1x32xf32>
    %c208 = arith.constant 208 : index
    %c0_56 = arith.constant 0 : index
    %176 = vector.load %arg0[%c208, %c0_56] : memref<240x128xf32, #tpu.memory_space<vmem>>, vector<32x1xf32>
    %cst_57 = arith.constant dense<0.000000e+00> : vector<1x1xf32>
    %177 = tpu.matmul %175, %176, %cst_57 {dimension_numbers = #tpu.dot_dimension_numbers<[1], [0], [0], [1], [0, 0, 1, 1], [], []>} : vector<1x32xf32>, vector<32x1xf32>, vector<1x1xf32> -> vector<1x1xf32>
    %178 = vector.extract_strided_slice %39 {offsets = [7, 32], sizes = [1, 1], strides = [1, 1]} : vector<8x128xf32> to vector<1x1xf32>
    %179 = arith.addf %177, %178 : vector<1x1xf32>
    %c0_58 = arith.constant 0 : index
    %c0_59 = arith.constant 0 : index
    %180 = vector.load %arg2[%c0_58, %c0_59] : memref<1x1xf32, #tpu.memory_space<vmem>>, vector<1x1xf32>
    tpu.vector_store %arg2[%c0_58, %c0_59], %179 {strides = array<i32>} : memref<1x1xf32, #tpu.memory_space<vmem>>, vector<1x1xf32>,
    return
  }
}

</mosaic_0001>

<bundles_post_ra>
// kernel: gnn_forward.1
= control target key start
LH: loop header
LB: loop body
LE: loop exit
PB: predicated region body
PF: predicated region fallthrough
CT: control target
= control target key end

     0   :  { %vm245_vm0 = vcmask 64512   ;;  %v12_v3 = vlaneseq  ;;  %s3214_s0 = inlined_call_operand.vmem [shape: f32[240,128], index: 0, kind: input, shape index: {}]   ;;  %s3215_s1 = inlined_call_operand.vmem [shape: f32[64,128], index: 1, kind: input, shape index: {}]   ;;  %s3216_s2 = inlined_call_operand.hbm [shape: f32[1,1], index: 2, kind: output, shape index: {}]  }
   0x1   :  { %v244_v0 = vld [vmem:[%s3214_s0] sm:$0xff]  ;;  %v243_v2 = vld [vmem:[%s3215_s1 + $0x8] sm:$0xff]  ;;  %v337_v4 = vld [vmem:[%s3214_s0 + $0x10] sm:$0xff] }
   0x2   :  { %v242_v1 = vld [vmem:[%s3215_s1] sm:$0xff]  ;;  %2259 = vmatprep.subr.mxu1 %v244_v0  ;;  %v338_v5 = vld [vmem:[%s3214_s0 + $0x18] sm:$0xff]  ;;  %v2729_v7 = vshrl.u32 %v12_v3, 7  ;;  %v2731_v8 = vand.u32 127, %v12_v3  ;;  %v340_v10 = vld [vmem:[%s3214_s0 + $0x28] sm:$0xff] }
   0x3   :  { %2261 = vmatprep.mubr.msk.f32.mxu1 %vm245_vm0, %v242_v1  ;;  %v339_v6 = vld [vmem:[%s3214_s0 + $0x20] sm:$0xff]  ;;  %2260 = vmatpush3.msra.mxu1 %v244_v0  ;;  %v2462_v9 = vpack.c.bf16 %v338_v5, %v337_v4 }
   0x4   :  { %7 = vsyncpa [#allocation3], 0  ;;  %2262 = vmatmul.mubr.msk.f32.vlgmr.msra.gmra.mrb[0].mxu1 %vm245_vm0, %v243_v2  ;;  %v2466_v11 = vpack.c.bf16 %v340_v10, %v339_v6  ;;  %v58_v12 = vmul.u32 16, %v2731_v8  ;;  %v100_v13 = vmul.u32 8, %v2729_v7  ;;  %v2739_v14 = vadd.s32 8, %v2729_v7  ;;  %s2686_s23 = smov 16  }
   0x5   :  { %2463 = vmatprep.subr.bf16.mxu1 %v2462_v9  ;;  %v52_v16 = vadd.s32 16, %v2729_v7  ;;  %v53_v18 = vadd.s32 24, %v2729_v7  ;;  %vm132_vm4 = vcmask 1043456   ;;  %v54_v19 = vadd.s32 32, %v2729_v7  ;;  %s2687_s24 = smov 48   ;;  %s2688_s25 = smov 32  }
   0x6   :  { %2465 = vmatpush3.bf16.msra.mxu1 %v2462_v9  ;;  %vm101_vm1 = vcmp.ge.s32.totalorder %v2731_v8, %v100_v13  ;;  %v102_v15 = vadd.s32 8, %v100_v13  ;;  %vm59_vm2 = vcmp.ge.s32.totalorder %v2729_v7, %v58_v12  ;;  %v67_v17 = vadd.s32 16, %v58_v12  ;;  %s2690_s26 = smov 64   ;;  %v341_v32 = vld [vmem:[%s3215_s1 + $0x10] sm:$0xff]  ;;  %s2691_s5 = smov 96   ;;  %v919_v42 = vld [vmem:[%s3215_s1 + $0x28] sm:$0xff] }
   0x7   :  { %2467 = vmatprep.subr.bf16.mxu1 %v2466_v11  ;;  %vm60_vm5 = vcmp.ge.s32.totalorder %v2739_v14, %v58_v12  ;;  %vm107_vm9 = vcmask 31744   ;;  %v55_v20 = vadd.s32 40, %v2729_v7  ;;  %v2684_v21 = vmov 0.0  }
   0x8   :  { %vm103_vm3 = vcmp.lt.s32.totalorder %v2731_v8, %v102_v15  ;;  %vm68_vm7 = vcmp.lt.s32.totalorder %v2729_v7, %v67_v17  ;;  %vm69_vm8 = vcmp.lt.s32.totalorder %v2739_v14, %v67_v17  ;;  %vm61_vm11 = vcmp.ge.s32.totalorder %v52_v16, %v58_v12 }
   0x9   :  { %vm104_vm6 = vmand %vm101_vm1, %vm103_vm3  ;;  %vm70_vm12 = vcmp.lt.s32.totalorder %v52_v16, %v67_v17  ;;  %v56_v23 = vadd.s32 48, %v2729_v7  ;;  %vm62_vm14 = vcmp.ge.s32.totalorder %v53_v18, %v58_v12  ;;  %vm71_vm15 = vcmp.lt.s32.totalorder %v53_v18, %v67_v17 }
   0xa   :  { %2469 = vmatpush3.bf16.msra.mxu1 %v2466_v11  ;;  %v2752_v22 = vsel %vm104_vm6, 1.0, %v2684_v21  ;;  %vm76_vm10 = vmand %vm59_vm2, %vm68_vm7  ;;  %vm63_vm1 = vcmp.ge.s32.totalorder %v54_v19, %v58_v12  ;;  %vm72_vm2 = vcmp.lt.s32.totalorder %v54_v19, %v67_v17  ;;  %v57_v27 = vadd.s32 56, %v2729_v7 }
   0xb   :  { %2245 = vmatprep.subr.msk.mxu0 %vm132_vm4, %v2752_v22  ;;  %vm77_vm13 = vmand %vm60_vm5, %vm69_vm8  ;;  %v2051_v24 = vsel %vm76_vm10, 1.0, %v2684_v21  ;;  %vm64_vm5 = vcmp.ge.s32.totalorder %v55_v20, %v58_v12  ;;  %vm73_vm6 = vcmp.lt.s32.totalorder %v55_v20, %v67_v17  ;;  %vm65_vm8 = vcmp.ge.s32.totalorder %v56_v23, %v58_v12 }
   0xc   :  { %2246 = vmatpush3.msk.msra.mxu0 %vm132_vm4, %v2752_v22  ;;  %2247 = vmatprep.mubr.msk.f32.mxu0 %vm107_vm9, %v2051_v24  ;;  %vm2765_vm0 = vmpackc.low %vm77_vm13, %vm76_vm10  ;;  %v2052_v26 = vsel %vm77_vm13, 1.0, %v2684_v21  ;;  %vm74_vm10 = vcmp.lt.s32.totalorder %v56_v23, %v67_v17  ;;  %vm66_vm13 = vcmp.ge.s32.totalorder %v57_v27, %v58_v12  ;;  %v2685_v39 = vmov 1.0|1.0  }
   0xd   :  { %2248 = vmatmul.mubr.msk.f32.vlgmr.msra.gmra.mrb[0].mxu0 %vm107_vm9, %v2052_v26  ;;  %vm2774_vm3 = vmand %vm61_vm11, %vm70_vm12  ;;  %2475 = vmatprep.subr.msk.bf16.mxu0 %vm2765_vm0, %v2685_v39  ;;  %v2689_v4 = vmov 1.0  }
   0xe   :  { %v2053_v29 = vsel %vm2774_vm3, 1.0, %v2684_v21  ;;  %vm2781_vm7 = vmand %vm62_vm14, %vm71_vm15  ;;  %vm75_vm14 = vcmp.lt.s32.totalorder %v57_v27, %v67_v17  ;;  %2477 = vmatpush3.bf16.msk.msra.mxu0 %vm2765_vm0, %v2685_v39 }
   0xf   :  { %2250 = vmatprep.mubr.msk.f32.mxu0 %vm107_vm9, %v2053_v29  ;;  %v2054_v31 = vsel %vm2781_vm7, 1.0, %v2684_v21  ;;  %vm2789_vm11 = vmand %vm63_vm1, %vm72_vm2 }
  0x10   :  { %v2055_v33 = vsel %vm2789_vm11, 1.0, %v2684_v21  ;;  %vm2796_vm12 = vmand %vm64_vm5, %vm73_vm6  ;;  %vm17_vm6 = vcmp.eq.s32.totalorder %v2729_v7, %v2731_v8 }
  0x11   :  { %2251 = vmatmul.mubr.msk.f32.gmra.mrb[2].mxu0 %vm107_vm9, %v2054_v31  ;;  %vm2801_vm15 = vmand %vm65_vm8, %vm74_vm10  ;;  %v2056_v36 = vsel %vm2796_vm12, 1.0, %v2684_v21  ;;  %v2867_v43 = vsel %vm17_vm6, 1.0, %v2684_v21  ;;  %vm46_vm8 = vcmask 261120   ;;  %vm43_vm10 = vcmask 130048   ;;  %v342_v31 = vld [vmem:[%s3215_s1 + $0x18] sm:$0xff] }
  0x12   :  { %2253 = vmatprep.mubr.msk.f32.mxu0 %vm107_vm9, %v2055_v33  ;;  %v2057_v37 = vsel %vm2801_vm15, 1.0, %v2684_v21  ;;  %vm83_vm1 = vmand %vm66_vm13, %vm75_vm14  ;;  %vm530_vm13 = vcmask 1048064  }
  0x13   :  { %v2058_v38 = vsel %vm83_vm1, 1.0, %v2684_v21  ;;  %vm2826_vm2 = vmpackc.low %vm2781_vm7, %vm2774_vm3  ;;  %vm18_vm7 = vcmp.eq.s32.totalorder %v2739_v14, %v2731_v8 }
  0x14   :  { %2479 = vmatprep.subr.msk.bf16.mxu0 %vm2826_vm2, %v2685_v39  ;;  %vm2840_vm5 = vmpackc.low %vm2796_vm12, %vm2789_vm11  ;;  %v2870_v44 = vsel %vm18_vm7, 1.0, %v2684_v21  ;;  %vm49_vm11 = vcmask 392192  }
  0x15   :  { %2254 = vmatmul.mubr.msk.f32.gmra.mrb[4].mxu0 %vm107_vm9, %v2056_v36  ;;  %vm2852_vm3 = vmpackc.low %vm83_vm1, %vm2801_vm15  ;;  %v2609_v45 = vpack.i.bf16 %v2870_v44, %v2867_v43  ;;  %vm549_vm15 = vcmask 523264  }
  0x16   :  { %2256 = vmatprep.mubr.msk.f32.mxu0 %vm107_vm9, %v2057_v37  ;;  %2481 = vmatpush3.bf16.msk.msra.mxu0 %vm2826_vm2, %v2685_v39 }
  0x17   :  { %2483 = vmatprep.subr.msk.bf16.mxu0 %vm2840_vm5, %v2685_v39  ;;  %2610 = vrot.lane.b32.xlu0 %v2609_v45, %s2686_s23 }
  0x18   :  { %2620 = vrot.lane.b32.xlu1 %v2609_v45, %s2687_s24 }
  0x19   :  { %2257 = vmatmul.mubr.msk.f32.gmra.mrb[6].mxu0 %vm107_vm9, %v2058_v38 }
  0x1a   :  { %2485 = vmatpush3.bf16.msk.msra.mxu0 %vm2840_vm5, %v2685_v39 }
  0x1b   :  { %2487 = vmatprep.subr.msk.bf16.mxu0 %vm2852_vm3, %v2685_v39  ;;  %2615 = vrot.lane.b32.xlu0 %v2609_v45, %s2688_s25 }
  0x1e   :  { %2489 = vmatpush3.bf16.msk.msra.mxu0 %vm2852_vm3, %v2685_v39 }
  0x89   :  { %v2611_v5 = vpop.permute.xlu0 %2610 }
  0x8a   :  { %v2613_v6 = vunpack.i.h.bf16 %v2611_v5  ;;  %v2612_v9 = vunpack.i.l.bf16 %v2611_v5  ;;  %v2621_v11 = vpop.permute.xlu1 %2620 }
  0x8b   :  { %v2623_v15 = vunpack.i.h.bf16 %v2621_v11  ;;  %v2622_v16 = vunpack.i.l.bf16 %v2621_v11  ;;  %v329_v11 = vsub.s32 0, %v2729_v7 }
  0x8c   :  { %v45_v12 = vsel %vm43_vm10, %v2870_v44, %v2613_v6  ;;  %v44_v14 = vsel %vm43_vm10, %v2867_v43, %v2612_v9 }
  0x8d   :  { %v2616_v8 = vpop.permute.xlu0 %2615 }
  0x8e   :  { %v2618_v10 = vunpack.i.h.bf16 %v2616_v8  ;;  %v2617_v13 = vunpack.i.l.bf16 %v2616_v8 }
  0x90   :  { %v48_v17 = vsel %vm46_vm8, %v45_v12, %v2618_v10  ;;  %v47_v18 = vsel %vm46_vm8, %v44_v14, %v2617_v13  ;;  %v2961_v12 = vld [vmem:[%s3214_s0 + $0x8] sm:$0xff] }
  0x91   :  { %v2933_v19 = vsel %vm49_vm11, %v48_v17, %v2623_v15  ;;  %v2936_v24 = vsel %vm49_vm11, %v47_v18, %v2622_v16  ;;  %v330_v15 = vrot.slane %v2961_v12, %v329_v11  ;;  %vm2694_vm11 = vmmov 0  }
  0xd7   :  { %v2876_v46 = vpop.f32.mrb[0].mxu1 }
  0xd8   :  { %v2878_v47 = vpop.f32.mrb[1].mxu1 }
  0xd9   :  { %2272 = vmatprep.mubr.msk.f32.mxu1 %vm46_vm8, %v2878_v47 }
  0xda   :  { %2273 = vmatmul.mubr.msk.f32.vlgmr.msra.gmra.mrb[2].mxu1 %vm46_vm8, %v2876_v46 }
  0xdb   :  { %2279 = vmatprep.mubr.msk.f32.mxu1 %vm43_vm10, %v2689_v4 }
  0xe0   :  { %v2884_v48 = vpop.f32.mrb[0].mxu0 }
  0xe1   :  { %v713_v49 = vmul.f32 %v2876_v46, %v2884_v48  ;;  %v2888_v50 = vpop.f32.mrb[1].mxu0 }
  0xe2   :  { %v712_v51 = vmul.f32 %v2878_v47, %v2888_v50 }
  0xe4   :  { %v2892_v52 = vpack.c.bf16 %v713_v49, %v712_v51  ;;  %v2894_v53 = vpop.f32.mrb[2].mxu0 }
  0xe5   :  { %v715_v54 = vmul.f32 %v2876_v46, %v2894_v53  ;;  %v2898_v55 = vpop.f32.mrb[3].mxu0 }
  0xe6   :  { %v714_v56 = vmul.f32 %v2878_v47, %v2898_v55  ;;  %2491 = vmatprep.subr.bf16.mxu0 %v2892_v52 }
  0xe8   :  { %v2903_v57 = vpack.c.bf16 %v715_v54, %v714_v56  ;;  %v2905_v58 = vpop.f32.mrb[4].mxu0 }
  0xe9   :  { %v717_v59 = vmul.f32 %v2876_v46, %v2905_v58  ;;  %v2909_v60 = vpop.f32.mrb[5].mxu0 }
  0xea   :  { %v716_v61 = vmul.f32 %v2878_v47, %v2909_v60 }
  0xec   :  { %v2913_v62 = vpack.c.bf16 %v717_v59, %v716_v61  ;;  %v2915_v63 = vpop.f32.mrb[6].mxu0 }
  0xed   :  { %v719_v0 = vmul.f32 %v2876_v46, %v2915_v63  ;;  %v2919_v1 = vpop.f32.mrb[7].mxu0 }
  0xee   :  { %v718_v2 = vmul.f32 %v2878_v47, %v2919_v1 }
  0xf0   :  { %v2923_v3 = vpack.c.bf16 %v719_v0, %v718_v2 }
 0x1ad   :  { %v2274_v20 = vpop.f32.mrb[2].mxu1 }
 0x1ae   :  { %v425_v23 = vmul.f32 %v2274_v20, %v2933_v19  ;;  %v415_v26 = vpop.f32.mrb[3].mxu1 }
 0x1af   :  { %v424_v27 = vmul.f32 %v415_v26, %v2936_v24 }
 0x1b1   :  { %v2470_v28 = vpack.c.bf16 %v425_v23, %v424_v27  ;;  %v830_v27 = vld [vmem:[%s3214_s0 + $0x78] sm:$0xff] }
 0x1b3   :  { %2471 = vmatprep.subr.bf16.mxu1 %v2470_v28 }
 0x1b4   :  { %2473 = vmatpush3.bf16.msra.mxu1 %v2470_v28 }
 0x1b5   :  { %2301 = vmatprep.subr.msk.mxu1 %vm132_vm4, %v2752_v22 }
 0x1b7   :  { %2280 = vmatmul.mubr.msk.f32.vlgmr.msra.gmra.mrb[4].mxu1 %vm43_vm10, %v2689_v4 }
 0x1b8   :  { %2302 = vmatpush3.msk.msra.mxu1 %vm132_vm4, %v2752_v22 }
 0x28a   :  { %v2281_v29 = vpop.f32.mrb[4].mxu1 }
 0x28b   :  { %508 = vrot.lane.b32.xlu0 %v2281_v29, %s2690_s26  ;;  %v495_v30 = vpop.f32.mrb[5].mxu1  ;;  %v831_v29 = vld [vmem:[%s3214_s0 + $0x80] sm:$0xff] }
 0x28c   :  { %506 = vrot.lane.b32.xlu1 %v495_v30, %s2690_s26  ;;  %v832_v30 = vld [vmem:[%s3214_s0 + $0x88] sm:$0xff] }
 0x28f   :  { %518 = vrot.lane.b32.xlu0 %v342_v31, %s2690_s26  ;;  %v2510_v31 = vpack.c.bf16 %v832_v30, %v831_v29 }
 0x290   :  { %516 = vrot.lane.b32.xlu1 %v341_v32, %s2690_s26  ;;  %v914_v32 = vld [vmem:[%s3214_s0 + $0x30] sm:$0xff] }
 0x2fd   :  { %v509_v33 = vpop.permute.xlu0 %508 }
 0x2fe   :  { %v507_v34 = vpop.permute.xlu1 %506  ;;  %v513_v35 = vadd.f32 %v2274_v20, %v509_v33  ;;  %v915_v33 = vld [vmem:[%s3214_s0 + $0x38] sm:$0xff] }
 0x2ff   :  { %v512_v36 = vadd.f32 %v507_v34, %v415_v26  ;;  %v2514_v34 = vpack.c.bf16 %v915_v33, %v914_v32 }
 0x301   :  { %v519_v37 = vpop.permute.xlu0 %518 }
 0x302   :  { %v523_v38 = vadd.f32 %v519_v37, %v513_v35  ;;  %v517_v45 = vpop.permute.xlu1 %516  ;;  %v799_v35 = vsub.s32 1, %v2729_v7 }
 0x303   :  { %v522_v49 = vadd.f32 %v517_v45, %v512_v36  ;;  %v805_v36 = vsub.s32 2, %v2729_v7 }
 0x304   :  { %v527_v51 = vmul.f32 0.2, %v523_v38  ;;  %vm525_vm12 = vcmp.gt.f32.partialorder %v523_v38, 0.0  ;;  %v800_v37 = vrot.slane %v2961_v12, %v799_v35 }
 0x305   :  { %v526_v54 = vmul.f32 0.2, %v522_v49  ;;  %vm524_vm14 = vcmp.gt.f32.partialorder %v522_v49, 0.0 }
 0x306   :  { %v529_v56 = vsel %vm525_vm12, %v523_v38, %v527_v51 }
 0x307   :  { %v534_v59 = vsel %vm530_vm13, %v529_v56, -inf  ;;  %v528_v61 = vsel %vm524_vm14, %v522_v49, %v526_v54  ;;  %v806_v49 = vrot.slane %v2961_v12, %v805_v36 }
 0x308   :  { %535 = vmax.xlane.f32.xlu0 %v534_v59  ;;  %v531_v0 = vsel %vm530_vm13, %v528_v61, -inf }
 0x309   :  { %532 = vmax.xlane.f32.xlu1 %v531_v0 }
 0x395   :  { %v536_v2 = vpop.xlane.xlu0 %535 }
 0x396   :  { %v538_v5 = vsub.f32 %v529_v56, %v536_v2  ;;  %v533_v6 = vpop.xlane.xlu1 %532 }
 0x397   :  { %v537_v8 = vsub.f32 %v528_v61, %v533_v6 }
 0x398   :  { %v541_v9 = vmul.f32 1.442695, %v538_v5 }
 0x399   :  { %v539_v10 = vmul.f32 1.442695, %v537_v8 }
 0x39a   :  { %2624 = vpow2.f32 %v541_v9 }
 0x39b   :  { %2626 = vpow2.f32 %v539_v10 }
 0x3a4   :  { %v2625_v13 = vpop.eup %2624 }
 0x3a5   :  { %v2627_v14 = vpop.eup %2626  ;;  %547 = vrot.lane.b32.xlu1 %v2625_v13, %s2690_s26  ;;  %v916_v13 = vld [vmem:[%s3214_s0 + $0x40] sm:$0xff] }
 0x3a6   :  { %545 = vrot.lane.b32.xlu0 %v2627_v14, %s2690_s26  ;;  %v917_v14 = vld [vmem:[%s3214_s0 + $0x48] sm:$0xff] }
 0x3a9   :  { %332 = vrot.lane.b32.xlu1 %v330_v15, %s2688_s25 }
 0x417   :  { %v548_v16 = vpop.permute.xlu1 %547 }
 0x418   :  { %v546_v17 = vpop.permute.xlu0 %545 }
 0x419   :  { %2298 = vmatprep.mubr.msk.f32.mxu0 %vm549_vm15, %v546_v17 }
 0x41a   :  { %2299 = vmatmul.mubr.msk.f32.vlgmr.msra.gmra.mrb[8].mxu0 %vm549_vm15, %v548_v16 }
 0x41b   :  { %2493 = vmatpush3.bf16.msra.mxu0 %v2892_v52  ;;  %2322 = vmatprep.mubr.msk.f32.mxu0 %vm549_vm15, %v546_v17  ;;  %v333_v18 = vpop.permute.xlu1 %332 }
 0x41c   :  { %2495 = vmatprep.subr.bf16.mxu0 %v2903_v57  ;;  %v335_v20 = vadd.f32 %v333_v18, %v2878_v47  ;;  %v336_v23 = vadd.f32 %v2876_v46, %v333_v18 }
 0x41e   :  { %823 = vrot.lane.b32.xlu1 %v336_v23, %s2691_s5  ;;  %821 = vrot.lane.b32.xlu0 %v335_v20, %s2691_s5  ;;  %v2518_v23 = vpack.c.bf16 %v917_v14, %v916_v13  ;;  %v1393_v14 = vld [vmem:[%s3214_s0 + $0x90] sm:$0xff] }
 0x41f   :  { %2497 = vmatpush3.bf16.msra.mxu0 %v2903_v57 }
 0x420   :  { %2499 = vmatprep.subr.bf16.mxu0 %v2913_v62 }
 0x423   :  { %2501 = vmatpush3.bf16.msra.mxu0 %v2913_v62 }
 0x424   :  { %2503 = vmatprep.subr.bf16.mxu0 %v2923_v3 }
 0x427   :  { %2505 = vmatpush3.bf16.msra.mxu0 %v2923_v3  ;;  %v829_v3 = vld [vmem:[%s3214_s0 + $0x70] sm:$0xff] }
 0x428   :  { %v2506_v28 = vpack.c.bf16 %v830_v27, %v829_v3 }
 0x42a   :  { %2323 = vmatmul.mubr.msk.f32.vlgmr.msra.gmra.mrb[10].mxu0 %vm549_vm15, %v548_v16  ;;  %2507 = vmatprep.subr.bf16.mxu1 %v2506_v28 }
 0x42b   :  { %2351 = vmatprep.mubr.msk.f32.mxu0 %vm43_vm10, %v2689_v4 }
 0x490   :  { %v822_v15 = vpop.permute.xlu0 %821  ;;  %v824_v17 = vpop.permute.xlu1 %823 }
 0x4ed   :  { %v2300_v46 = vpop.f32.mrb[8].mxu0 }
 0x4ee   :  { %v620_v47 = vpop.f32.mrb[9].mxu0 }
 0x4ef   :  { %2628 = vrcp.f32 %v620_v47 }
 0x4f0   :  { %2630 = vrcp.f32 %v2300_v46 }
 0x4f9   :  { %v2629_v52 = vpop.eup %2628 }
 0x4fa   :  { %v2631_v26 = vpop.eup %2630  ;;  %2303 = vmatprep.mubr.msk.f32.mxu1 %vm107_vm9, %v2629_v52 }
 0x4fb   :  { %2304 = vmatmul.mubr.msk.f32.vlgmr.msra.gmra.mrb[6].mxu1 %vm107_vm9, %v2631_v26 }
 0x4fc   :  { %2509 = vmatpush3.bf16.msra.mxu1 %v2506_v28 }
 0x4fd   :  { %v2324_v57 = vpop.f32.mrb[10].mxu0  ;;  %2511 = vmatprep.subr.bf16.mxu1 %v2510_v31 }
 0x4fe   :  { %v786_v62 = vpop.f32.mrb[11].mxu0 }
 0x500   :  { %2513 = vmatpush3.bf16.msra.mxu1 %v2510_v31 }
 0x501   :  { %2515 = vmatprep.subr.bf16.mxu1 %v2514_v34 }
 0x5ce   :  { %v2305_v38 = vpop.f32.mrb[6].mxu1 }
 0x5cf   :  { %v796_v45 = vmul.f32 %v2324_v57, %v2305_v38  ;;  %v703_v51 = vpop.f32.mrb[7].mxu1 }
 0x5d0   :  { %v795_v54 = vmul.f32 %v786_v62, %v703_v51 }
 0x5d1   :  { %v802_v56 = vmul.f32 %v800_v37, %v796_v45 }
 0x5d2   :  { %v801_v59 = vmul.f32 %v800_v37, %v795_v54 }
 0x5d3   :  { %v808_v61 = vadd.f32 %v806_v49, %v802_v56 }
 0x5d4   :  { %v807_v0 = vadd.f32 %v806_v49, %v801_v59 }
 0x5d5   :  { %v813_v2 = vmul.f32 1.442695, %v808_v61  ;;  %vm810_vm1 = vcmp.gt.f32.partialorder %v808_v61, 0.0 }
 0x5d6   :  { %v811_v5 = vmul.f32 1.442695, %v807_v0  ;;  %vm809_vm6 = vcmp.gt.f32.partialorder %v807_v0, 0.0 }
 0x5d7   :  { %2632 = vpow2.f32 %v813_v2 }
 0x5d8   :  { %2634 = vpow2.f32 %v811_v5 }
 0x5e1   :  { %v2633_v6 = vpop.eup %2632 }
 0x5e2   :  { %v2635_v8 = vpop.eup %2634  ;;  %v2091_v9 = vadd.f32 -1.0, %v2633_v6 }
 0x5e3   :  { %v2090_v10 = vadd.f32 -1.0, %v2635_v8 }
 0x5e4   :  { %v818_v11 = vsel %vm810_vm1, %v808_v61, %v2091_v9 }
 0x5e5   :  { %v817_v16 = vsel %vm809_vm6, %v807_v0, %v2090_v10  ;;  %v3016_v20 = vadd.f32 %v824_v17, %v818_v11  ;;  %v1395_v17 = vld [vmem:[%s3214_s0 + $0xa0] sm:$0xff] }
 0x5e6   :  { %v3014_v18 = vadd.f32 %v822_v15, %v817_v16  ;;  %v1394_v15 = vld [vmem:[%s3214_s0 + $0x98] sm:$0xff] }
 0x5e7   :  { %v2558_v16 = vpack.c.bf16 %v1394_v15, %v1393_v14 }
 0x5e8   :  { %2333 = vmatprep.mubr.msk.f32.mxu1 %vm46_vm8, %v3014_v18 }
 0x5e9   :  { %2334 = vmatmul.mubr.msk.f32.vlgmr.msra.gmra.mrb[8].mxu1 %vm46_vm8, %v3016_v20 }
 0x5ea   :  { %2517 = vmatpush3.bf16.msra.mxu1 %v2514_v34 }
 0x5eb   :  { %2519 = vmatprep.subr.bf16.mxu1 %v2518_v23 }
 0x5ee   :  { %2521 = vmatpush3.bf16.msra.mxu1 %v2518_v23  ;;  %v1396_v23 = vld [vmem:[%s3214_s0 + $0xa8] sm:$0xff] }
 0x5ef   :  { %2527 = vmatprep.subr.msk.bf16.mxu1 %vm2765_vm0, %v2685_v39 }
 0x6bc   :  { %v2335_v46 = vpop.f32.mrb[8].mxu1 }
 0x6bd   :  { %v905_v47 = vpop.f32.mrb[9].mxu1  ;;  %v1285_v52 = vmul.f32 %v2335_v46, %v2884_v48  ;;  %v1287_v26 = vmul.f32 %v2335_v46, %v2894_v53  ;;  %v1289_v57 = vmul.f32 %v2335_v46, %v2905_v58  ;;  %v1291_v62 = vmul.f32 %v2335_v46, %v2915_v63  ;;  %v918_v63 = vld [vmem:[%s3215_s1 + $0x20] sm:$0xff] }
 0x6be   :  { %2344 = vmatprep.mubr.msk.f32.mxu1 %vm46_vm8, %v905_v47  ;;  %v1284_v3 = vmul.f32 %v905_v47, %v2888_v50  ;;  %v1286_v27 = vmul.f32 %v905_v47, %v2898_v55  ;;  %v1288_v28 = vmul.f32 %v905_v47, %v2909_v60  ;;  %v1290_v29 = vmul.f32 %v905_v47, %v2919_v1  ;;  %v1478_v47 = vld [vmem:[%s3214_s0 + $0x50] sm:$0xff] }
 0x6bf   :  { %2345 = vmatmul.mubr.msk.f32.vlgmr.msra.gmra.mrb[10].mxu1 %vm46_vm8, %v2335_v46  ;;  %v2562_v46 = vpack.c.bf16 %v1396_v23, %v1395_v17 }
 0x6c0   :  { %v3035_v30 = vpack.c.bf16 %v1285_v52, %v1284_v3  ;;  %2529 = vmatpush3.bf16.msk.msra.mxu1 %vm2765_vm0, %v2685_v39  ;;  %v3040_v48 = vpack.c.bf16 %v1287_v26, %v1286_v27  ;;  %v3042_v53 = vpack.c.bf16 %v1289_v57, %v1288_v28  ;;  %v3044_v58 = vpack.c.bf16 %v1291_v62, %v1290_v29  ;;  %v1479_v52 = vld [vmem:[%s3214_s0 + $0x58] sm:$0xff]  ;;  %v1480_v26 = vld [vmem:[%s3214_s0 + $0x60] sm:$0xff]  ;;  %v1481_v62 = vld [vmem:[%s3214_s0 + $0x68] sm:$0xff] }
 0x6c1   :  { %2531 = vmatprep.subr.msk.bf16.mxu1 %vm2826_vm2, %v2685_v39  ;;  %v2566_v57 = vpack.c.bf16 %v1479_v52, %v1478_v47  ;;  %v2570_v3 = vpack.c.bf16 %v1481_v62, %v1480_v26  ;;  %v1371_v29 = vsub.s32 3, %v2729_v7 }
 0x6c4   :  { %2533 = vmatpush3.bf16.msk.msra.mxu1 %vm2826_vm2, %v2685_v39 }
 0x6c5   :  { %2535 = vmatprep.subr.msk.bf16.mxu1 %vm2840_vm5, %v2685_v39 }
 0x6c8   :  { %2537 = vmatpush3.bf16.msk.msra.mxu1 %vm2840_vm5, %v2685_v39 }
 0x6c9   :  { %2539 = vmatprep.subr.msk.bf16.mxu1 %vm2852_vm3, %v2685_v39 }
 0x6cc   :  { %2541 = vmatpush3.bf16.msk.msra.mxu1 %vm2852_vm3, %v2685_v39  ;;  %vm1668_vm3 = vcmask 261248  }
 0x6cd   :  { %2559 = vmatprep.subr.bf16.mxu1 %v2558_v16 }
 0x792   :  { %v2346_v25 = vpop.f32.mrb[10].mxu1 }
 0x793   :  { %v1002_v40 = vmul.f32 %v2346_v25, %v2933_v19  ;;  %v992_v50 = vpop.f32.mrb[11].mxu1 }
 0x794   :  { %v1001_v55 = vmul.f32 %v992_v50, %v2936_v24 }
 0x796   :  { %v2522_v60 = vpack.c.bf16 %v1002_v40, %v1001_v55 }
 0x798   :  { %2523 = vmatprep.subr.bf16.mxu0 %v2522_v60 }
 0x799   :  { %2525 = vmatpush3.bf16.msra.mxu0 %v2522_v60 }
 0x79a   :  { %2373 = vmatprep.subr.msk.mxu0 %vm132_vm4, %v2752_v22 }
 0x79c   :  { %2352 = vmatmul.mubr.msk.f32.vlgmr.msra.gmra.mrb[12].mxu0 %vm43_vm10, %v2689_v4 }
 0x79d   :  { %2374 = vmatpush3.msk.msra.mxu0 %vm132_vm4, %v2752_v22 }
 0x79e   :  { %2543 = vmatprep.subr.bf16.mxu0 %v3035_v30 }
 0x86f   :  { %v2353_v39 = vpop.f32.mrb[12].mxu0 }
 0x870   :  { %1082 = vrot.lane.b32.xlu1 %v2353_v39, %s2690_s26  ;;  %v1069_v41 = vpop.f32.mrb[13].mxu0 }
 0x871   :  { %1080 = vrot.lane.b32.xlu0 %v1069_v41, %s2690_s26 }
 0x874   :  { %1092 = vrot.lane.b32.xlu1 %v919_v42, %s2690_s26 }
 0x875   :  { %1090 = vrot.lane.b32.xlu0 %v918_v63, %s2690_s26 }
 0x8e2   :  { %v1083_v22 = vpop.permute.xlu1 %1082 }
 0x8e3   :  { %v1081_v1 = vpop.permute.xlu0 %1080  ;;  %v1087_v19 = vadd.f32 %v2346_v25, %v1083_v22 }
 0x8e4   :  { %v1086_v24 = vadd.f32 %v1081_v1, %v992_v50 }
 0x8e6   :  { %v1093_v31 = vpop.permute.xlu1 %1092 }
 0x8e7   :  { %v1097_v32 = vadd.f32 %v1093_v31, %v1087_v19  ;;  %v1091_v33 = vpop.permute.xlu0 %1090 }
 0x8e8   :  { %v1096_v34 = vadd.f32 %v1091_v33, %v1086_v24 }
 0x8e9   :  { %v1101_v35 = vmul.f32 0.2, %v1097_v32  ;;  %vm1099_vm4 = vcmp.gt.f32.partialorder %v1097_v32, 0.0 }
 0x8ea   :  { %v1100_v36 = vmul.f32 0.2, %v1096_v34  ;;  %vm1098_vm0 = vcmp.gt.f32.partialorder %v1096_v34, 0.0 }
 0x8eb   :  { %v1103_v37 = vsel %vm1099_vm4, %v1097_v32, %v1101_v35 }
 0x8ec   :  { %v1107_v38 = vsel %vm530_vm13, %v1103_v37, -inf  ;;  %v1102_v45 = vsel %vm1098_vm0, %v1096_v34, %v1100_v36 }
 0x8ed   :  { %1108 = vmax.xlane.f32.xlu1 %v1107_v38  ;;  %v1104_v49 = vsel %vm530_vm13, %v1102_v45, -inf }
 0x8ee   :  { %1105 = vmax.xlane.f32.xlu0 %v1104_v49 }
 0x97a   :  { %v1109_v51 = vpop.xlane.xlu1 %1108 }
 0x97b   :  { %v1111_v54 = vsub.f32 %v1103_v37, %v1109_v51  ;;  %v1106_v56 = vpop.xlane.xlu0 %1105 }
 0x97c   :  { %v1110_v59 = vsub.f32 %v1102_v45, %v1106_v56 }
 0x97d   :  { %v1114_v61 = vmul.f32 1.442695, %v1111_v54 }
 0x97e   :  { %v1112_v0 = vmul.f32 1.442695, %v1110_v59 }
 0x97f   :  { %2636 = vpow2.f32 %v1114_v61 }
 0x980   :  { %2638 = vpow2.f32 %v1112_v0 }
 0x989   :  { %v2637_v2 = vpop.eup %2636 }
 0x98a   :  { %v2639_v5 = vpop.eup %2638  ;;  %1120 = vrot.lane.b32.xlu1 %v2637_v2, %s2690_s26 }
 0x98b   :  { %1118 = vrot.lane.b32.xlu0 %v2639_v5, %s2690_s26 }
 0x9fc   :  { %v1121_v8 = vpop.permute.xlu1 %1120 }
 0x9fd   :  { %v1119_v6 = vpop.permute.xlu0 %1118 }
 0x9fe   :  { %2370 = vmatprep.mubr.msk.f32.mxu1 %vm549_vm15, %v1119_v6 }
 0x9ff   :  { %2371 = vmatmul.mubr.msk.f32.vlgmr.msra.gmra.mrb[12].mxu1 %vm549_vm15, %v1121_v8 }
 0xa00   :  { %2561 = vmatpush3.bf16.msra.mxu1 %v2558_v16 }
 0xa01   :  { %2563 = vmatprep.subr.bf16.mxu1 %v2562_v46 }
 0xa04   :  { %2565 = vmatpush3.bf16.msra.mxu1 %v2562_v46 }
 0xad2   :  { %v2372_v9 = vpop.f32.mrb[12].mxu1 }
 0xad3   :  { %v1192_v10 = vpop.f32.mrb[13].mxu1 }
 0xad4   :  { %2640 = vrcp.f32 %v1192_v10 }
 0xad5   :  { %2642 = vrcp.f32 %v2372_v9 }
 0xade   :  { %v2641_v11 = vpop.eup %2640 }
 0xadf   :  { %v2643_v13 = vpop.eup %2642  ;;  %2375 = vmatprep.mubr.msk.f32.mxu0 %vm107_vm9, %v2641_v11 }
 0xae0   :  { %2376 = vmatmul.mubr.msk.f32.vlgmr.msra.gmra.mrb[14].mxu0 %vm107_vm9, %v2643_v13 }
 0xae1   :  { %2545 = vmatpush3.bf16.msra.mxu0 %v3035_v30  ;;  %2394 = vmatprep.mubr.msk.f32.mxu0 %vm549_vm15, %v1119_v6  ;;  %v1377_v30 = vsub.s32 4, %v2729_v7 }
 0xae2   :  { %2547 = vmatprep.subr.bf16.mxu0 %v3040_v48 }
 0xae3   :  { %v1378_v25 = vrot.slane %v2961_v12, %v1377_v30  ;;  %v1872_v30 = vld [vmem:[%s3214_s0 + $0xb0] sm:$0xff] }
 0xae5   :  { %2549 = vmatpush3.bf16.msra.mxu0 %v3040_v48  ;;  %v1372_v48 = vrot.slane %v2961_v12, %v1371_v29  ;;  %v2693_v29 = vmov 0.0|0.0  }
 0xae6   :  { %2551 = vmatprep.subr.bf16.mxu0 %v3042_v53 }
 0xae9   :  { %2553 = vmatpush3.bf16.msra.mxu0 %v3042_v53 }
 0xaea   :  { %2555 = vmatprep.subr.bf16.mxu0 %v3044_v58 }
 0xaed   :  { %2557 = vmatpush3.bf16.msra.mxu0 %v3044_v58 }
 0xaee   :  { %2567 = vmatprep.subr.bf16.mxu0 %v2566_v57 }
 0xaf0   :  { %2395 = vmatmul.mubr.msk.f32.vlgmr.msra.gmra.mrb[16].mxu0 %vm549_vm15, %v1121_v8 }
 0xaf1   :  { %2569 = vmatpush3.bf16.msra.mxu0 %v2566_v57 }
 0xaf2   :  { %2571 = vmatprep.subr.bf16.mxu0 %v2570_v3 }
 0xaf5   :  { %2573 = vmatpush3.bf16.msra.mxu0 %v2570_v3 }
 0xaf6   :  { %2582 = vmatprep.subr.bf16.mxu0 %v2693_v29 }
 0xbb3   :  { %v2377_v27 = vpop.f32.mrb[14].mxu0 }
 0xbb4   :  { %v1275_v28 = vpop.f32.mrb[15].mxu0 }
 0xbc3   :  { %v2396_v53 = vpop.f32.mrb[16].mxu0 }
 0xbc4   :  { %v1368_v58 = vmul.f32 %v2396_v53, %v2377_v27  ;;  %v1358_v40 = vpop.f32.mrb[17].mxu0  ;;  %v1874_v53 = vld [vmem:[%s3214_s0 + $0xc0] sm:$0xff] }
 0xbc5   :  { %v1367_v50 = vmul.f32 %v1358_v40, %v1275_v28 }
 0xbc6   :  { %v1374_v55 = vmul.f32 %v1372_v48, %v1368_v58 }
 0xbc7   :  { %v1373_v60 = vmul.f32 %v1372_v48, %v1367_v50  ;;  %v1873_v48 = vld [vmem:[%s3214_s0 + $0xb8] sm:$0xff] }
 0xbc8   :  { %v1380_v39 = vadd.f32 %v1378_v25, %v1374_v55  ;;  %v2586_v58 = vpack.c.bf16 %v1873_v48, %v1872_v30 }
 0xbc9   :  { %v1379_v41 = vadd.f32 %v1378_v25, %v1373_v60  ;;  %v1875_v25 = vld [vmem:[%s3214_s0 + $0xc8] sm:$0xff]  ;;  %v1780_v60 = vsub.s32 5, %v2729_v7 }
 0xbca   :  { %v1385_v42 = vmul.f32 1.442695, %v1380_v39  ;;  %vm1382_vm9 = vcmp.gt.f32.partialorder %v1380_v39, 0.0  ;;  %v2589_v40 = vpack.c.bf16 %v1875_v25, %v1874_v53 }
 0xbcb   :  { %v1383_v63 = vmul.f32 1.442695, %v1379_v41  ;;  %vm1381_vm2 = vcmp.gt.f32.partialorder %v1379_v41, 0.0 }
 0xbcc   :  { %2644 = vpow2.f32 %v1385_v42 }
 0xbcd   :  { %2646 = vpow2.f32 %v1383_v63 }
 0xbd6   :  { %v2645_v22 = vpop.eup %2644 }
 0xbd7   :  { %v2647_v1 = vpop.eup %2646  ;;  %v2114_v19 = vadd.f32 -1.0, %v2645_v22 }
 0xbd8   :  { %v2113_v24 = vadd.f32 -1.0, %v2647_v1 }
 0xbd9   :  { %v1390_v31 = vsel %vm1382_vm9, %v1380_v39, %v2114_v19  ;;  %v1786_v39 = vsub.s32 6, %v2729_v7 }
 0xbda   :  { %v1389_v32 = vsel %vm1381_vm2, %v1379_v41, %v2113_v24  ;;  %v3132_v34 = vadd.f32 %v1390_v31, %v3016_v20  ;;  %v1781_v41 = vrot.slane %v2961_v12, %v1780_v60 }
 0xbdb   :  { %v3129_v33 = vadd.f32 %v1389_v32, %v3014_v18  ;;  %v1787_v19 = vrot.slane %v2961_v12, %v1786_v39 }
 0xbdd   :  { %2405 = vmatprep.mubr.msk.f32.mxu1 %vm46_vm8, %v3129_v33 }
 0xbde   :  { %2406 = vmatmul.mubr.msk.f32.vlgmr.msra.gmra.mrb[14].mxu1 %vm46_vm8, %v3132_v34 }
 0xbdf   :  { %2423 = vmatprep.mubr.msk.f32.mxu1 %vm43_vm10, %v2689_v4 }
 0xcb1   :  { %v2407_v35 = vpop.f32.mrb[14].mxu1 }
 0xcb2   :  { %v1469_v36 = vpop.f32.mrb[15].mxu1 }
 0xcb3   :  { %v2578_v37 = vpack.c.bf16 %v2407_v35, %v1469_v36  ;;  %2416 = vmatprep.mubr.msk.f32.mxu0 %vm46_vm8, %v1469_v36 }
 0xcb4   :  { %2417 = vmatmul.mubr.msk.f32.vlgmr.msra.gmra.mrb[18].mxu0 %vm46_vm8, %v2407_v35 }
 0xcb5   :  { %2437 = vmatprep.mubr.msk.f32.mxu0 %vm2694_vm11, %v2684_v21 }
 0xd87   :  { %v2418_v18 = vpop.f32.mrb[18].mxu0 }
 0xd88   :  { %v1566_v20 = vmul.f32 %v2418_v18, %v2870_v44  ;;  %v1556_v38 = vpop.f32.mrb[19].mxu0  ;;  %v1483_v44 = vld [vmem:[%s3215_s1 + $0x38] sm:$0xff] }
 0xd89   :  { %v1565_v45 = vmul.f32 %v2867_v43, %v1556_v38  ;;  %v1482_v43 = vld [vmem:[%s3215_s1 + $0x30] sm:$0xff]  ;;  %s2692_s1 = smov 112  }
 0xd8b   :  { %v2574_v49 = vpack.c.bf16 %v1566_v20, %v1565_v45 }
 0xd8d   :  { %2575 = vmatprep.subr.bf16.mxu1 %v2574_v49 }
 0xd8e   :  { %2577 = vmatpush3.bf16.msra.mxu1 %v2574_v49 }
 0xd8f   :  { %2579 = vmatprep.subr.bf16.mxu1 %v2578_v37 }
 0xd91   :  { %2424 = vmatmul.mubr.msk.f32.vlgmr.msra.gmra.mrb[16].mxu1 %vm43_vm10, %v2689_v4 }
 0xd92   :  { %2581 = vmatpush3.bf16.msra.mxu1 %v2578_v37 }
 0xd93   :  { %2585 = vmatprep.subr.bf16.mxu1 %v2693_v29 }
 0xe64   :  { %v2425_v51 = vpop.f32.mrb[16].mxu1 }
 0xe65   :  { %1646 = vrot.lane.b32.xlu1 %v2425_v51, %s2686_s23  ;;  %v1633_v54 = vpop.f32.mrb[17].mxu1 }
 0xe66   :  { %1644 = vrot.lane.b32.xlu0 %v1633_v54, %s2686_s23 }
 0xe69   :  { %1656 = vrot.lane.b32.xlu1 %v1483_v44, %s2686_s23 }
 0xe6a   :  { %1654 = vrot.lane.b32.xlu0 %v1482_v43, %s2686_s23 }
 0xed7   :  { %v1647_v56 = vpop.permute.xlu1 %1646 }
 0xed8   :  { %v1645_v59 = vpop.permute.xlu0 %1644  ;;  %v1651_v61 = vadd.f32 %v2418_v18, %v1647_v56 }
 0xed9   :  { %v1650_v0 = vadd.f32 %v1645_v59, %v1556_v38  ;;  %v1953_v59 = vld [vmem:[%s3214_s0 + $0xd0] sm:$0xff] }
 0xedb   :  { %v1657_v2 = vpop.permute.xlu1 %1656 }
 0xedc   :  { %v1661_v5 = vadd.f32 %v1657_v2, %v1651_v61  ;;  %v1655_v6 = vpop.permute.xlu0 %1654  ;;  %v1954_v61 = vld [vmem:[%s3214_s0 + $0xd8] sm:$0xff]  ;;  %v1956_v2 = vld [vmem:[%s3214_s0 + $0xe8] sm:$0xff] }
 0xedd   :  { %v1660_v8 = vadd.f32 %v1655_v6, %v1650_v0 }
 0xede   :  { %v1665_v9 = vmul.f32 0.2, %v1661_v5  ;;  %vm1663_vm5 = vcmp.gt.f32.partialorder %v1661_v5, 0.0 }
 0xedf   :  { %v1664_v10 = vmul.f32 0.2, %v1660_v8  ;;  %vm1662_vm7 = vcmp.gt.f32.partialorder %v1660_v8, 0.0 }
 0xee0   :  { %v1667_v11 = vsel %vm1663_vm5, %v1661_v5, %v1665_v9 }
 0xee1   :  { %v1672_v13 = vsel %vm1668_vm3, %v1667_v11, -inf  ;;  %v1666_v14 = vsel %vm1662_vm7, %v1660_v8, %v1664_v10 }
 0xee2   :  { %1673 = vmax.xlane.f32.xlu1 %v1672_v13  ;;  %v1669_v15 = vsel %vm1668_vm3, %v1666_v14, -inf }
 0xee3   :  { %1670 = vmax.xlane.f32.xlu0 %v1669_v15 }
 0xf6f   :  { %v1674_v16 = vpop.xlane.xlu1 %1673 }
 0xf70   :  { %v1676_v17 = vsub.f32 %v1667_v11, %v1674_v16  ;;  %v1671_v23 = vpop.xlane.xlu0 %1670 }
 0xf71   :  { %v1675_v46 = vsub.f32 %v1666_v14, %v1671_v23 }
 0xf72   :  { %v1679_v47 = vmul.f32 1.442695, %v1676_v17 }
 0xf73   :  { %v1677_v52 = vmul.f32 1.442695, %v1675_v46 }
 0xf74   :  { %2648 = vpow2.f32 %v1679_v47 }
 0xf75   :  { %2650 = vpow2.f32 %v1677_v52 }
 0xf7e   :  { %v2649_v26 = vpop.eup %2648 }
 0xf7f   :  { %v2651_v57 = vpop.eup %2650  ;;  %1685 = vrot.lane.b32.xlu1 %v2649_v26, %s2692_s1 }
 0xf80   :  { %1683 = vrot.lane.b32.xlu0 %v2651_v57, %s2692_s1 }
 0xff1   :  { %v1686_v62 = vpop.permute.xlu1 %1685 }
 0xff2   :  { %v1684_v3 = vpop.permute.xlu0 %1683  ;;  %v1692_v27 = vsel %vm43_vm10, %v1686_v62, 0.0 }
 0xff3   :  { %1693 = vadd.xlane.f32.xlu1 %v1692_v27  ;;  %2430 = vmatprep.mubr.msk.f32.mxu1 %vm43_vm10, %v1684_v3  ;;  %v1689_v28 = vsel %vm43_vm10, %v1684_v3, 0.0 }
 0xff4   :  { %2431 = vmatmul.mubr.msk.f32.vlgmr.msra.gmra.mrb[18].mxu1 %vm43_vm10, %v1686_v62  ;;  %1690 = vadd.xlane.f32.xlu0 %v1689_v28 }
 0xff5   :  { %2448 = vmatprep.mubr.msk.f32.mxu1 %vm2694_vm11, %v2684_v21  ;;  %2587 = vmatpush3.bf16.msra.mxu1 %v2586_v58 }
 0xff6   :  { %2588 = vmatprep.subr.bf16.mxu1 %v2693_v29 }
 0xff9   :  { %2590 = vmatpush3.bf16.msra.mxu1 %v2589_v40 }
0x1080   :  { %v1694_v50 = vpop.xlane.xlu1 %1693 }
0x1081   :  { %v1691_v55 = vpop.xlane.xlu0 %1690  ;;  %2652 = vrcp.f32 %v1694_v50 }
0x1082   :  { %2654 = vrcp.f32 %v1691_v55 }
0x108b   :  { %v2653_v42 = vpop.eup %2652 }
0x108c   :  { %v2655_v22 = vpop.eup %2654 }
0x10c7   :  { %v2432_v63 = vpop.f32.mrb[18].mxu1 }
0x10c8   :  { %v1777_v1 = vmul.f32 %v2653_v42, %v2432_v63  ;;  %v1767_v24 = vpop.f32.mrb[19].mxu1 }
0x10c9   :  { %v1776_v31 = vmul.f32 %v2655_v22, %v1767_v24 }
0x10ca   :  { %v1783_v32 = vmul.f32 %v1781_v41, %v1777_v1 }
0x10cb   :  { %v1782_v35 = vmul.f32 %v1781_v41, %v1776_v31 }
0x10cc   :  { %v1789_v36 = vadd.f32 %v1787_v19, %v1783_v32 }
0x10cd   :  { %v1788_v37 = vadd.f32 %v1787_v19, %v1782_v35 }
0x10ce   :  { %v1794_v18 = vmul.f32 1.442695, %v1789_v36  ;;  %vm1791_vm12 = vcmp.gt.f32.partialorder %v1789_v36, 0.0 }
0x10cf   :  { %v1792_v20 = vmul.f32 1.442695, %v1788_v37  ;;  %vm1790_vm13 = vcmp.gt.f32.partialorder %v1788_v37, 0.0 }
0x10d0   :  { %2656 = vpow2.f32 %v1794_v18 }
0x10d1   :  { %2658 = vpow2.f32 %v1792_v20 }
0x10da   :  { %v2657_v38 = vpop.eup %2656 }
0x10db   :  { %v2659_v7 = vpop.eup %2658  ;;  %v2124_v45 = vadd.f32 -1.0, %v2657_v38 }
0x10dc   :  { %v2123_v49 = vadd.f32 -1.0, %v2659_v7 }
0x10dd   :  { %v1799_v51 = vsel %vm1791_vm12, %v1789_v36, %v2124_v45 }
0x10de   :  { %v1798_v54 = vsel %vm1790_vm13, %v1788_v37, %v2123_v49  ;;  %v1801_v44 = vadd.f32 %v1799_v51, %v3132_v34  ;;  %v1877_v34 = vrot.slane %v2961_v12, 7 }
0x10df   :  { %v1800_v43 = vadd.f32 %v1798_v54, %v3129_v33  ;;  %v2592_v33 = vpack.c.bf16 %v1954_v61, %v1953_v59 }
0x10e0   :  { %1957 = vrot.lane.b32.xlu0 %v1877_v34, %s2691_s5  ;;  %s2695_s5 = smov [#allocation2]  }
0x10e1   :  { %v2583_v56 = vpack.c.bf16 %v1801_v44, %v1800_v43  ;;  %s2041_s9 = sshll.u32 %s2695_s5, 4  ;;  %s2042_s9 = int_to_ptr.vmem [resolvable:$true] %s2041_s9 }
0x10e2   :  { %s2660_s10 = scalar_lea.vmem %s2042_s9, 16  ;;  %p2665_p1 = scmp.lt.s32.totalorder %s2042_s9, %s2042_s9 }
0x10e3   :  { %2584 = vmatpush3.bf16.msra.mxu0 %v2583_v56  ;;  %p2661_p0 = scmp.ne.s32.totalorder %s2042_s9, %s2660_s10 }
0x10e4   :  { %2591 = vmatprep.subr.bf16.mxu0 %v2693_v29 }
0x10e6   :  { %2438 = vmatmul.mubr.msk.f32.vlgmr.msra.gmra.mrb[20].mxu0 %vm43_vm10, %v2689_v4  ;;  %vm2033_vm10 = vcmask 0  }
0x10e7   :  { %2459 = vmatprep.mubr.msk.f32.mxu0 %vm2694_vm11, %v2684_v21  ;;  %2593 = vmatpush3.bf16.msra.mxu0 %v2592_v33  ;;  %v1955_v21 = vld [vmem:[%s3214_s0 + $0xe0] sm:$0xff]  ;;  %s2664_s0 = scalar_lea.vmem %s2042_s9, 32 }
0x10e8   :  { %2594 = vmatprep.subr.bf16.mxu0 %v2693_v29  ;;  %v2595_v5 = vpack.c.bf16 %v1956_v2, %v1955_v21  ;;  %p2666_p2 = scmp.lt.s32.totalorder %s2664_s0, %s2660_s10 }
0x10ea   :  { %p2667_p3 = por %p2666_p2, %p2665_p1 }
0x10eb   :  { %2596 = vmatpush3.bf16.msra.mxu0 %v2595_v5 }
0x10ec   :  { %p2668_p4 = pnand %p2667_p3, %p2661_p0 }
0x1152   :  { %v1958_v10 = vpop.permute.xlu0 %1957 }
0x11b9   :  { %v1868_v0 = vpop.f32.mrb[20].mxu0 }
0x11ba   :  { %v2439_v4 = vpop.f32.mrb[21].mxu0  ;;  %2449 = vmatmul.mubr.msk.f32.vlgmr.msra.gmra.mrb[20].mxu1 %vm46_vm8, %v1868_v0 }
0x128d   :  { %v1948_v12 = vpop.f32.mrb[20].mxu1 }
0x128e   :  { %v1949_v6 = vadd.f32 %v1948_v12, %v1877_v34  ;;  %v2450_v8 = vpop.f32.mrb[21].mxu1 }
0x1290   :  { %v1952_v9 = vmax.f32 %v1949_v6, 0.0 }
0x1292   :  { %2460 = vmatmul.mubr.msk.f32.vlgmr.msra.gmra.mrb[22].mxu0 %vm46_vm8, %v1952_v9 }
0x1365   :  { %v2029_v11 = vpop.f32.mrb[22].mxu0 }
0x1366   :  { %v2461_v13 = vpop.f32.mrb[23].mxu0  ;;  %v2030_v14 = vadd.f32 %v2029_v11, %v1958_v10 }
0x1368   :  { %2034 = vst.msk [vmem:[#allocation2] sm:$0x1] %vm2033_vm10, %v2030_v14 }
0x1369   :  { %2671 = shalt.err (!%p2668_p4)
}
0x136a   :  { %s2672_s13 = scalar_lea.hbm %s3216_s2, 16 }
0x136b   :  { %p2673_p5 = scmp.ne.s32.totalorder %s3216_s2, %s2672_s13  ;;  %p2676_p6 = scmp.lt.u32.totalorder %s2672_s13, %s3216_s2 }
0x136d   :  { %p2678_p7 = pnand %p2676_p6, %p2673_p5 }
0x136f   :  { %2681 = shalt.err (!%p2678_p7)
}
0x1370   :  { %2044 = dma.vmem_to_hbm [thread:$0]  %s2042_s9, 16, %s3216_s2, [#allocation3]  }
0x1371   :  { %2682 = dma.done.wait [#allocation3], 16  }
0x1372   :  { %2683 = vsyncadd [#allocation3], 4294967280 }
0x1373   :  { %2048 = vsyncpa [#allocation3], 1 }

</bundles_post_ra>
